<compile_context>
chip_gen: v5e
topology: v5e:2x2
jax: 0.10.0
libtpu: 0.0.40
codegen_flags: <defaults>
</compile_context>

<pallas_src>
import functools

import jax
import jax.numpy as jnp
from jax.experimental import pallas as pl
from jax.experimental.pallas import tpu as pltpu

K = 31       # Conv1d kernel size
PAD = 15     # Conv1d padding (so L_out == L_in for stride 1)


def _conv1d_bn_relu_kernel(x_ref, w_ref, shift_ref, o_ref, xpad_ref, col_ref,
                           *, C_in, L, CK, CKP, G):
    # Per grid step n:
    #   x_ref:     (1, C_in, L)     this batch element
    #   w_ref:     (C_out, CKP)     BN-scale-folded, im2col-flattened weights (resident)
    #   shift_ref: (C_out, 1)       folded BN shift (+ conv bias), f32
    #   o_ref:     (1, C_out, L)
    #   xpad_ref:  (C_in, XW)       lane-aligned zero-halo staging buffer, XW = roundup(L+K-1,128)
    #   col_ref:   (CKP, L)         im2col block
    dt = xpad_ref.dtype
    XW = xpad_ref.shape[1]

    # Zero only what must be zero; every step (cheap, megacore-safe — see header comment).
    xpad_ref[:, :PAD] = jnp.zeros((C_in, PAD), dt)                 # left conv halo
    xpad_ref[:, PAD + L:] = jnp.zeros((C_in, XW - PAD - L), dt)    # right conv halo + lane pad
    if CKP > CK:
        col_ref[CK:, :] = jnp.zeros((CKP - CK, L), dt)             # contraction-pad rows

    # Stage this batch element, then load the staging buffer ONCE into vregs: all K shifted
    # slabs below are static value slices -> XLU lane rotates, no further VMEM reads.
    xpad_ref[:, PAD:PAD + L] = x_ref[0]
    xp = xpad_ref[...]

    # Build im2col: col[k*C_in + i, l] = xpad[i, l + k]. Group G = 8 // C_in taps per store so
    # every store (except a possible leftover) is a full 8-sublane-aligned (8, L) slab.
    k = 0
    row = 0
    while k < K:
        g = min(G, K - k)
        if g == 1:
            slab = xp[:, k:k + L]
        else:
            slab = jnp.concatenate([xp[:, k + t:k + t + L] for t in range(g)], axis=0)
        col_ref[row:row + g * C_in, :] = slab
        row += g * C_in
        k += g

    # One full-contraction MXU matmul + fused BN-shift / ReLU epilogue; lane-dense output store.
    acc = jnp.dot(w_ref[...], col_ref[...], preferred_element_type=jnp.float32)
    y = acc + shift_ref[...]
    o_ref[0] = jnp.maximum(y, 0.0).astype(o_ref.dtype)


def model_conv1_forward(x, w, b, gamma, beta, running_mean, running_var,
                        eps=1e-5, is_batchnorm=True):
    """Forward pass of modelConv1. x: (N, C_in, L), w: (C_out, C_in, K), b: (C_out,)."""
    N, C_in, L = x.shape
    C_out = w.shape[0]
    dt = x.dtype

    # Fold eval-mode BatchNorm (+ conv bias) into per-output-channel scale/shift.
    if is_batchnorm:
        rstd = jax.lax.rsqrt(running_var.astype(jnp.float32) + eps)
        scale = gamma.astype(jnp.float32) * rstd
        shift = beta.astype(jnp.float32) + (
            b.astype(jnp.float32) - running_mean.astype(jnp.float32)) * scale
    else:
        scale = jnp.ones((C_out,), jnp.float32)
        shift = b.astype(jnp.float32)

    # Fold the scale into the conv weights and flatten to im2col layout:
    #   w2[o, k*C_in + i] = w[o, i, k] * scale[o];   contraction zero-padded to CKP (mult. of 128).
    CK = C_in * K
    CKP = ((CK + 127) // 128) * 128
    w2 = (w.astype(jnp.float32) * scale[:, None, None]).transpose(0, 2, 1).reshape(C_out, CK)
    w2 = jnp.pad(w2, ((0, 0), (0, CKP - CK))).astype(dt)
    shift = shift.reshape(C_out, 1).astype(jnp.float32)

    XW = ((L + K - 1 + 127) // 128) * 128                     # lane-aligned staging width
    G = (8 // C_in) if (C_in <= 8 and 8 % C_in == 0) else 1   # kernel taps per aligned slab

    kernel = functools.partial(_conv1d_bn_relu_kernel,
                               C_in=C_in, L=L, CK=CK, CKP=CKP, G=G)

    return pl.pallas_call(
        kernel,
        out_shape=jax.ShapeDtypeStruct((N, C_out, L), dt),
        grid_spec=pltpu.PrefetchScalarGridSpec(
            num_scalar_prefetch=0,
            grid=(N,),  # batch axis: sharded across TCs on v7x, pipelined DMA on all chips
            in_specs=[
                pl.BlockSpec((1, C_in, L), lambda n: (n, 0, 0)),
                pl.BlockSpec((C_out, CKP), lambda n: (0, 0)),   # resident across steps
                pl.BlockSpec((C_out, 1), lambda n: (0, 0)),     # resident across steps
            ],
            out_specs=pl.BlockSpec((1, C_out, L), lambda n: (n, 0, 0)),
            scratch_shapes=[
                pltpu.VMEM((C_in, XW), dt),   # zero-halo, lane-aligned staging buffer
                pltpu.VMEM((CKP, L), dt),     # im2col block
            ],
        ),
        compiler_params=pltpu.CompilerParams(dimension_semantics=("parallel",)),
    )(x, w2, shift)


def _reference(x, w, b, gamma, beta, running_mean, running_var, eps=1e-5):
    # Pure-JAX reference of the PyTorch forward (eval-mode BN).
    z = jax.lax.conv_general_dilated(
        x, w, window_strides=(1,), padding=((PAD, PAD),),
        dimension_numbers=("NCH", "OIH", "NCH"),
    ) + b[None, :, None]
    y = gamma[None, :, None] * (z - running_mean[None, :, None]) * \
        jax.lax.rsqrt(running_var + eps)[None, :, None] + beta[None, :, None]
    return jnp.maximum(y, 0.0)


if __name__ == "__main__":
    N, C_in, C_out, L = 2, 4, 8, 128

    key = jax.random.PRNGKey(0)
    kx, kw, kb, kg, kbe = jax.random.split(key, 5)

    x = jax.random.normal(kx, (N, C_in, L), dtype=jnp.float32)
    # Deterministic synthetic parameters (shapes from nn.Conv1d / nn.BatchNorm1d).
    w = 0.1 * jax.random.normal(kw, (C_out, C_in, K), dtype=jnp.float32)
    b = 0.1 * jax.random.normal(kb, (C_out,), dtype=jnp.float32)
    gamma = 1.0 + 0.1 * jax.random.normal(kg, (C_out,), dtype=jnp.float32)
    beta = 0.1 * jax.random.normal(kbe, (C_out,), dtype=jnp.float32)
    running_mean = jnp.zeros((C_out,), dtype=jnp.float32)
    running_var = jnp.ones((C_out,), dtype=jnp.float32)

    out = model_conv1_forward(x, w, b, gamma, beta, running_mean, running_var,
                              is_batchnorm=True)
    out = jax.block_until_ready(out)

    ref = _reference(x, w, b, gamma, beta, running_mean, running_var)
    assert out.shape == (N, C_out, L)
    assert jnp.allclose(out, ref, atol=1e-4, rtol=1e-4), \
        f"max err {jnp.max(jnp.abs(out - ref))}"

    print("KERNEL_OK")
</pallas_src>

<mosaic_0001>
module attributes {stable_mosaic.version = 11 : i64} {
  func.func @_conv1d_bn_relu_kernel(%arg0: i32, %arg1: memref<1x4x128xf32, #tpu.memory_space<vmem>>, %arg2: memref<8x128xf32, #tpu.memory_space<vmem>>, %arg3: memref<8x1xf32, #tpu.memory_space<vmem>>, %arg4: memref<1x8x128xf32, #tpu.memory_space<vmem>>, %arg5: memref<4x256xf32, #tpu.memory_space<vmem>>, %arg6: memref<128x128xf32, #tpu.memory_space<vmem>>) attributes {dimension_semantics = [#tpu.dimension_semantics<parallel>], iteration_bounds = array<i64: 2>, scalar_prefetch = 0 : i64, scratch_operands = 2 : i64, tpu.core_type = #tpu.core_type<tc>, window_params = [{transform_indices = @transform_0, window_bounds = array<i64: 1, 4, 128>}, {pipeline_mode = #tpu.pipeline_mode<synchronous>, transform_indices = @transform_1, window_bounds = array<i64: 8, 128>}, {pipeline_mode = #tpu.pipeline_mode<synchronous>, transform_indices = @transform_2, window_bounds = array<i64: 8, 1>}, {transform_indices = @transform_3, window_bounds = array<i64: 1, 8, 128>}]} {
    %cst = arith.constant 0.000000e+00 : f32
    %0 = vector.broadcast %cst : f32 to vector<4x15xf32>
    %c0 = arith.constant 0 : index
    %c0_0 = arith.constant 0 : index
    %1 = vector.load %arg5[%c0, %c0_0] : memref<4x256xf32, #tpu.memory_space<vmem>>, vector<4x15xf32>
    tpu.vector_store %arg5[%c0, %c0_0], %0 {strides = array<i32>} : memref<4x256xf32, #tpu.memory_space<vmem>>, vector<4x15xf32>,
    %cst_1 = arith.constant 0.000000e+00 : f32
    %2 = vector.broadcast %cst_1 : f32 to vector<4x113xf32>
    %c0_2 = arith.constant 0 : index
    %c143 = arith.constant 143 : index
    %3 = vector.load %arg5[%c0_2, %c143] : memref<4x256xf32, #tpu.memory_space<vmem>>, vector<4x113xf32>
    tpu.vector_store %arg5[%c0_2, %c143], %2 {strides = array<i32>} : memref<4x256xf32, #tpu.memory_space<vmem>>, vector<4x113xf32>,
    %cst_3 = arith.constant 0.000000e+00 : f32
    %4 = vector.broadcast %cst_3 : f32 to vector<4x128xf32>
    %c124 = arith.constant 124 : index
    %c0_4 = arith.constant 0 : index
    %5 = vector.load %arg6[%c124, %c0_4] : memref<128x128xf32, #tpu.memory_space<vmem>>, vector<4x128xf32>
    tpu.vector_store %arg6[%c124, %c0_4], %4 {strides = array<i32>} : memref<128x128xf32, #tpu.memory_space<vmem>>, vector<4x128xf32>,
    %c0_5 = arith.constant 0 : index
    %c0_6 = arith.constant 0 : index
    %c0_7 = arith.constant 0 : index
    %6 = vector.load %arg1[%c0_5, %c0_6, %c0_7] : memref<1x4x128xf32, #tpu.memory_space<vmem>>, vector<1x4x128xf32>
    %7 = vector.shape_cast %6 : vector<1x4x128xf32> to vector<4x128xf32>
    %c0_8 = arith.constant 0 : index
    %c15 = arith.constant 15 : index
    %8 = vector.load %arg5[%c0_8, %c15] : memref<4x256xf32, #tpu.memory_space<vmem>>, vector<4x128xf32>
    tpu.vector_store %arg5[%c0_8, %c15], %7 {strides = array<i32>} : memref<4x256xf32, #tpu.memory_space<vmem>>, vector<4x128xf32>,
    %c0_9 = arith.constant 0 : index
    %c0_10 = arith.constant 0 : index
    %9 = vector.load %arg5[%c0_9, %c0_10] : memref<4x256xf32, #tpu.memory_space<vmem>>, vector<4x256xf32>
    %10 = vector.extract_strided_slice %9 {offsets = [0, 0], sizes = [4, 128], strides = [1, 1]} : vector<4x256xf32> to vector<4x128xf32>
    %11 = vector.extract_strided_slice %9 {offsets = [0, 1], sizes = [4, 128], strides = [1, 1]} : vector<4x256xf32> to vector<4x128xf32>
    %12 = tpu.concatenate %10, %11 in 0 : vector<4x128xf32>, vector<4x128xf32> -> vector<8x128xf32>
    %c0_11 = arith.constant 0 : index
    %c0_12 = arith.constant 0 : index
    %13 = vector.load %arg6[%c0_11, %c0_12] : memref<128x128xf32, #tpu.memory_space<vmem>>, vector<8x128xf32>
    tpu.vector_store %arg6[%c0_11, %c0_12], %12 {strides = array<i32>} : memref<128x128xf32, #tpu.memory_space<vmem>>, vector<8x128xf32>,
    %14 = vector.extract_strided_slice %9 {offsets = [0, 2], sizes = [4, 128], strides = [1, 1]} : vector<4x256xf32> to vector<4x128xf32>
    %15 = vector.extract_strided_slice %9 {offsets = [0, 3], sizes = [4, 128], strides = [1, 1]} : vector<4x256xf32> to vector<4x128xf32>
    %16 = tpu.concatenate %14, %15 in 0 : vector<4x128xf32>, vector<4x128xf32> -> vector<8x128xf32>
    %c8 = arith.constant 8 : index
    %c0_13 = arith.constant 0 : index
    %17 = vector.load %arg6[%c8, %c0_13] : memref<128x128xf32, #tpu.memory_space<vmem>>, vector<8x128xf32>
    tpu.vector_store %arg6[%c8, %c0_13], %16 {strides = array<i32>} : memref<128x128xf32, #tpu.memory_space<vmem>>, vector<8x128xf32>,
    %18 = vector.extract_strided_slice %9 {offsets = [0, 4], sizes = [4, 128], strides = [1, 1]} : vector<4x256xf32> to vector<4x128xf32>
    %19 = vector.extract_strided_slice %9 {offsets = [0, 5], sizes = [4, 128], strides = [1, 1]} : vector<4x256xf32> to vector<4x128xf32>
    %20 = tpu.concatenate %18, %19 in 0 : vector<4x128xf32>, vector<4x128xf32> -> vector<8x128xf32>
    %c16 = arith.constant 16 : index
    %c0_14 = arith.constant 0 : index
    %21 = vector.load %arg6[%c16, %c0_14] : memref<128x128xf32, #tpu.memory_space<vmem>>, vector<8x128xf32>
    tpu.vector_store %arg6[%c16, %c0_14], %20 {strides = array<i32>} : memref<128x128xf32, #tpu.memory_space<vmem>>, vector<8x128xf32>,
    %22 = vector.extract_strided_slice %9 {offsets = [0, 6], sizes = [4, 128], strides = [1, 1]} : vector<4x256xf32> to vector<4x128xf32>
    %23 = vector.extract_strided_slice %9 {offsets = [0, 7], sizes = [4, 128], strides = [1, 1]} : vector<4x256xf32> to vector<4x128xf32>
    %24 = tpu.concatenate %22, %23 in 0 : vector<4x128xf32>, vector<4x128xf32> -> vector<8x128xf32>
    %c24 = arith.constant 24 : index
    %c0_15 = arith.constant 0 : index
    %25 = vector.load %arg6[%c24, %c0_15] : memref<128x128xf32, #tpu.memory_space<vmem>>, vector<8x128xf32>
    tpu.vector_store %arg6[%c24, %c0_15], %24 {strides = array<i32>} : memref<128x128xf32, #tpu.memory_space<vmem>>, vector<8x128xf32>,
    %26 = vector.extract_strided_slice %9 {offsets = [0, 8], sizes = [4, 128], strides = [1, 1]} : vector<4x256xf32> to vector<4x128xf32>
    %27 = vector.extract_strided_slice %9 {offsets = [0, 9], sizes = [4, 128], strides = [1, 1]} : vector<4x256xf32> to vector<4x128xf32>
    %28 = tpu.concatenate %26, %27 in 0 : vector<4x128xf32>, vector<4x128xf32> -> vector<8x128xf32>
    %c32 = arith.constant 32 : index
    %c0_16 = arith.constant 0 : index
    %29 = vector.load %arg6[%c32, %c0_16] : memref<128x128xf32, #tpu.memory_space<vmem>>, vector<8x128xf32>
    tpu.vector_store %arg6[%c32, %c0_16], %28 {strides = array<i32>} : memref<128x128xf32, #tpu.memory_space<vmem>>, vector<8x128xf32>,
    %30 = vector.extract_strided_slice %9 {offsets = [0, 10], sizes = [4, 128], strides = [1, 1]} : vector<4x256xf32> to vector<4x128xf32>
    %31 = vector.extract_strided_slice %9 {offsets = [0, 11], sizes = [4, 128], strides = [1, 1]} : vector<4x256xf32> to vector<4x128xf32>
    %32 = tpu.concatenate %30, %31 in 0 : vector<4x128xf32>, vector<4x128xf32> -> vector<8x128xf32>
    %c40 = arith.constant 40 : index
    %c0_17 = arith.constant 0 : index
    %33 = vector.load %arg6[%c40, %c0_17] : memref<128x128xf32, #tpu.memory_space<vmem>>, vector<8x128xf32>
    tpu.vector_store %arg6[%c40, %c0_17], %32 {strides = array<i32>} : memref<128x128xf32, #tpu.memory_space<vmem>>, vector<8x128xf32>,
    %34 = vector.extract_strided_slice %9 {offsets = [0, 12], sizes = [4, 128], strides = [1, 1]} : vector<4x256xf32> to vector<4x128xf32>
    %35 = vector.extract_strided_slice %9 {offsets = [0, 13], sizes = [4, 128], strides = [1, 1]} : vector<4x256xf32> to vector<4x128xf32>
    %36 = tpu.concatenate %34, %35 in 0 : vector<4x128xf32>, vector<4x128xf32> -> vector<8x128xf32>
    %c48 = arith.constant 48 : index
    %c0_18 = arith.constant 0 : index
    %37 = vector.load %arg6[%c48, %c0_18] : memref<128x128xf32, #tpu.memory_space<vmem>>, vector<8x128xf32>
    tpu.vector_store %arg6[%c48, %c0_18], %36 {strides = array<i32>} : memref<128x128xf32, #tpu.memory_space<vmem>>, vector<8x128xf32>,
    %38 = vector.extract_strided_slice %9 {offsets = [0, 14], sizes = [4, 128], strides = [1, 1]} : vector<4x256xf32> to vector<4x128xf32>
    %39 = vector.extract_strided_slice %9 {offsets = [0, 15], sizes = [4, 128], strides = [1, 1]} : vector<4x256xf32> to vector<4x128xf32>
    %40 = tpu.concatenate %38, %39 in 0 : vector<4x128xf32>, vector<4x128xf32> -> vector<8x128xf32>
    %c56 = arith.constant 56 : index
    %c0_19 = arith.constant 0 : index
    %41 = vector.load %arg6[%c56, %c0_19] : memref<128x128xf32, #tpu.memory_space<vmem>>, vector<8x128xf32>
    tpu.vector_store %arg6[%c56, %c0_19], %40 {strides = array<i32>} : memref<128x128xf32, #tpu.memory_space<vmem>>, vector<8x128xf32>,
    %42 = vector.extract_strided_slice %9 {offsets = [0, 16], sizes = [4, 128], strides = [1, 1]} : vector<4x256xf32> to vector<4x128xf32>
    %43 = vector.extract_strided_slice %9 {offsets = [0, 17], sizes = [4, 128], strides = [1, 1]} : vector<4x256xf32> to vector<4x128xf32>
    %44 = tpu.concatenate %42, %43 in 0 : vector<4x128xf32>, vector<4x128xf32> -> vector<8x128xf32>
    %c64 = arith.constant 64 : index
    %c0_20 = arith.constant 0 : index
    %45 = vector.load %arg6[%c64, %c0_20] : memref<128x128xf32, #tpu.memory_space<vmem>>, vector<8x128xf32>
    tpu.vector_store %arg6[%c64, %c0_20], %44 {strides = array<i32>} : memref<128x128xf32, #tpu.memory_space<vmem>>, vector<8x128xf32>,
    %46 = vector.extract_strided_slice %9 {offsets = [0, 18], sizes = [4, 128], strides = [1, 1]} : vector<4x256xf32> to vector<4x128xf32>
    %47 = vector.extract_strided_slice %9 {offsets = [0, 19], sizes = [4, 128], strides = [1, 1]} : vector<4x256xf32> to vector<4x128xf32>
    %48 = tpu.concatenate %46, %47 in 0 : vector<4x128xf32>, vector<4x128xf32> -> vector<8x128xf32>
    %c72 = arith.constant 72 : index
    %c0_21 = arith.constant 0 : index
    %49 = vector.load %arg6[%c72, %c0_21] : memref<128x128xf32, #tpu.memory_space<vmem>>, vector<8x128xf32>
    tpu.vector_store %arg6[%c72, %c0_21], %48 {strides = array<i32>} : memref<128x128xf32, #tpu.memory_space<vmem>>, vector<8x128xf32>,
    %50 = vector.extract_strided_slice %9 {offsets = [0, 20], sizes = [4, 128], strides = [1, 1]} : vector<4x256xf32> to vector<4x128xf32>
    %51 = vector.extract_strided_slice %9 {offsets = [0, 21], sizes = [4, 128], strides = [1, 1]} : vector<4x256xf32> to vector<4x128xf32>
    %52 = tpu.concatenate %50, %51 in 0 : vector<4x128xf32>, vector<4x128xf32> -> vector<8x128xf32>
    %c80 = arith.constant 80 : index
    %c0_22 = arith.constant 0 : index
    %53 = vector.load %arg6[%c80, %c0_22] : memref<128x128xf32, #tpu.memory_space<vmem>>, vector<8x128xf32>
    tpu.vector_store %arg6[%c80, %c0_22], %52 {strides = array<i32>} : memref<128x128xf32, #tpu.memory_space<vmem>>, vector<8x128xf32>,
    %54 = vector.extract_strided_slice %9 {offsets = [0, 22], sizes = [4, 128], strides = [1, 1]} : vector<4x256xf32> to vector<4x128xf32>
    %55 = vector.extract_strided_slice %9 {offsets = [0, 23], sizes = [4, 128], strides = [1, 1]} : vector<4x256xf32> to vector<4x128xf32>
    %56 = tpu.concatenate %54, %55 in 0 : vector<4x128xf32>, vector<4x128xf32> -> vector<8x128xf32>
    %c88 = arith.constant 88 : index
    %c0_23 = arith.constant 0 : index
    %57 = vector.load %arg6[%c88, %c0_23] : memref<128x128xf32, #tpu.memory_space<vmem>>, vector<8x128xf32>
    tpu.vector_store %arg6[%c88, %c0_23], %56 {strides = array<i32>} : memref<128x128xf32, #tpu.memory_space<vmem>>, vector<8x128xf32>,
    %58 = vector.extract_strided_slice %9 {offsets = [0, 24], sizes = [4, 128], strides = [1, 1]} : vector<4x256xf32> to vector<4x128xf32>
    %59 = vector.extract_strided_slice %9 {offsets = [0, 25], sizes = [4, 128], strides = [1, 1]} : vector<4x256xf32> to vector<4x128xf32>
    %60 = tpu.concatenate %58, %59 in 0 : vector<4x128xf32>, vector<4x128xf32> -> vector<8x128xf32>
    %c96 = arith.constant 96 : index
    %c0_24 = arith.constant 0 : index
    %61 = vector.load %arg6[%c96, %c0_24] : memref<128x128xf32, #tpu.memory_space<vmem>>, vector<8x128xf32>
    tpu.vector_store %arg6[%c96, %c0_24], %60 {strides = array<i32>} : memref<128x128xf32, #tpu.memory_space<vmem>>, vector<8x128xf32>,
    %62 = vector.extract_strided_slice %9 {offsets = [0, 26], sizes = [4, 128], strides = [1, 1]} : vector<4x256xf32> to vector<4x128xf32>
    %63 = vector.extract_strided_slice %9 {offsets = [0, 27], sizes = [4, 128], strides = [1, 1]} : vector<4x256xf32> to vector<4x128xf32>
    %64 = tpu.concatenate %62, %63 in 0 : vector<4x128xf32>, vector<4x128xf32> -> vector<8x128xf32>
    %c104 = arith.constant 104 : index
    %c0_25 = arith.constant 0 : index
    %65 = vector.load %arg6[%c104, %c0_25] : memref<128x128xf32, #tpu.memory_space<vmem>>, vector<8x128xf32>
    tpu.vector_store %arg6[%c104, %c0_25], %64 {strides = array<i32>} : memref<128x128xf32, #tpu.memory_space<vmem>>, vector<8x128xf32>,
    %66 = vector.extract_strided_slice %9 {offsets = [0, 28], sizes = [4, 128], strides = [1, 1]} : vector<4x256xf32> to vector<4x128xf32>
    %67 = vector.extract_strided_slice %9 {offsets = [0, 29], sizes = [4, 128], strides = [1, 1]} : vector<4x256xf32> to vector<4x128xf32>
    %68 = tpu.concatenate %66, %67 in 0 : vector<4x128xf32>, vector<4x128xf32> -> vector<8x128xf32>
    %c112 = arith.constant 112 : index
    %c0_26 = arith.constant 0 : index
    %69 = vector.load %arg6[%c112, %c0_26] : memref<128x128xf32, #tpu.memory_space<vmem>>, vector<8x128xf32>
    tpu.vector_store %arg6[%c112, %c0_26], %68 {strides = array<i32>} : memref<128x128xf32, #tpu.memory_space<vmem>>, vector<8x128xf32>,
    %70 = vector.extract_strided_slice %9 {offsets = [0, 30], sizes = [4, 128], strides = [1, 1]} : vector<4x256xf32> to vector<4x128xf32>
    %c120 = arith.constant 120 : index
    %c0_27 = arith.constant 0 : index
    %71 = vector.load %arg6[%c120, %c0_27] : memref<128x128xf32, #tpu.memory_space<vmem>>, vector<4x128xf32>
    tpu.vector_store %arg6[%c120, %c0_27], %70 {strides = array<i32>} : memref<128x128xf32, #tpu.memory_space<vmem>>, vector<4x128xf32>,
    %c0_28 = arith.constant 0 : index
    %c0_29 = arith.constant 0 : index
    %72 = vector.load %arg2[%c0_28, %c0_29] : memref<8x128xf32, #tpu.memory_space<vmem>>, vector<8x128xf32>
    %c0_30 = arith.constant 0 : index
    %c0_31 = arith.constant 0 : index
    %73 = vector.load %arg6[%c0_30, %c0_31] : memref<128x128xf32, #tpu.memory_space<vmem>>, vector<128x128xf32>
    %cst_32 = arith.constant dense<0.000000e+00> : vector<8x128xf32>
    %74 = tpu.matmul %72, %73, %cst_32 {dimension_numbers = #tpu.dot_dimension_numbers<[1], [0], [0], [1], [0, 0, 1, 1], [], []>} : vector<8x128xf32>, vector<128x128xf32>, vector<8x128xf32> -> vector<8x128xf32>
    %c0_33 = arith.constant 0 : index
    %c0_34 = arith.constant 0 : index
    %75 = vector.load %arg3[%c0_33, %c0_34] : memref<8x1xf32, #tpu.memory_space<vmem>>, vector<8x1xf32>
    %76 = vector.broadcast %75 : vector<8x1xf32> to vector<8x128xf32>
    %77 = arith.addf %74, %76 : vector<8x128xf32>
    %cst_35 = arith.constant 0.000000e+00 : f32
    %78 = vector.broadcast %cst_35 : f32 to vector<8x128xf32>
    %79 = arith.maximumf %77, %78 : vector<8x128xf32>
    %c0_36 = arith.constant 0 : index
    %c0_37 = arith.constant 0 : index
    %c0_38 = arith.constant 0 : index
    %80 = vector.load %arg4[%c0_36, %c0_37, %c0_38] : memref<1x8x128xf32, #tpu.memory_space<vmem>>, vector<1x8x128xf32>
    %81 = vector.shape_cast %80 : vector<1x8x128xf32> to vector<8x128xf32>
    %82 = vector.shape_cast %79 : vector<8x128xf32> to vector<1x8x128xf32>
    tpu.vector_store %arg4[%c0_36, %c0_37, %c0_38], %82 {strides = array<i32>} : memref<1x8x128xf32, #tpu.memory_space<vmem>>, vector<1x8x128xf32>,
    return
  }
  func.func @transform_0(%arg0: i32) -> (i32, i32, i32) {
    %c0_i32 = arith.constant 0 : i32
    %c0_i32_0 = arith.constant 0 : i32
    %c0_i32_1 = arith.constant 0 : i32
    return %arg0, %c0_i32, %c0_i32_0 : i32, i32, i32
  }
  func.func @transform_1(%arg0: i32) -> (i32, i32) {
    %c0_i32 = arith.constant 0 : i32
    %c0_i32_0 = arith.constant 0 : i32
    %c0_i32_1 = arith.constant 0 : i32
    return %c0_i32, %c0_i32_0 : i32, i32
  }
  func.func @transform_2(%arg0: i32) -> (i32, i32) {
    %c0_i32 = arith.constant 0 : i32
    %c0_i32_0 = arith.constant 0 : i32
    %c0_i32_1 = arith.constant 0 : i32
    return %c0_i32, %c0_i32_0 : i32, i32
  }
  func.func @transform_3(%arg0: i32) -> (i32, i32, i32) {
    %c0_i32 = arith.constant 0 : i32
    %c0_i32_0 = arith.constant 0 : i32
    %c0_i32_1 = arith.constant 0 : i32
    return %arg0, %c0_i32, %c0_i32_0 : i32, i32, i32
  }
}

</mosaic_0001>

<bundles_post_ra>
// kernel: tpu_custom_call.1
= control target key start
LH: loop header
LB: loop body
LE: loop exit
PB: predicated region body
PF: predicated region fallthrough
CT: control target
= control target key end

     0   :  { %8 = vsyncpa [#allocation5], 0  ;;  %s1301_s0 = inlined_call_operand.vmem [shape: f32[2,4,128], index: 0, kind: input, shape index: {}]   ;;  %s1302_s1 = inlined_call_operand.hbm [shape: f32[8,128], index: 1, kind: input, shape index: {}]   ;;  %s1303_s2 = inlined_call_operand.vmem [shape: f32[8,1], index: 2, kind: input, shape index: {}]   ;;  %s1304_s3 = inlined_call_operand.hbm [shape: f32[2,8,128], index: 3, kind: output, shape index: {}]  }
   0x1   :  { %9 = vsyncpa [#allocation6], 0 }
   0x2   :  { %11 = vsyncpa [#allocation6 + $0x1], 0  ;;  %s969_s12 = smov 0   ;;  %s971_s13 = smov 0  }
   0x3   :  { %s973_s14 = smov 0   ;;  %s975_s15 = smov 0  }
   0x4 LB: > { %s990_s16 = sadd.s32 4294967295, %s927_s15   ;;  %s748_s17 = sadd.s32 4294967294, %s927_s15   ;;  %s927_s15 = sphi %s975_s15, %s1310_s15   ;;  %s923_s14 = sphi %s973_s14, %s1309_s14   ;;  %s919_s13 = sphi %s971_s13, %s1308_s13   ;;  %s915_s12 = sphi %s969_s12, %s1307_s12  }
   0x5   : > { %s994_s18 = sadd.s32 1, %s927_s15   ;;  %s92_s19 = sadd.s32 1, %s923_s14 }
   0x6   : > { %s89_s20 = ssub.s32 %s927_s15, %s994_s18  ;;  %p102_p0 = scmp.ne.s32.totalorder %s923_s14, %s919_s13 }
   0x7   : > { %p90_p1 = scmp.eq.s32.totalorder %s89_s20, 0  ;;  %p103_p2 = scmp.eq.s32.totalorder %s990_s16, 1 }
   0x8   : > { %p108_p3 = scmp.ne.s32.totalorder %s919_s13, %s915_s12  ;;  %p109_p4 = scmp.eq.s32.totalorder %s748_s17, 1 }
   0x9   : > { %s1005_s21 = scalar_select %p90_p1, %s923_s14, %s92_s19  }
   0xa   : > { %p1007_p5 = por %p103_p2, %p102_p0  ;;  %p1011_p6 = por %p109_p4, %p108_p3 }
   0xb   : > { %p749_p7 = scmp.ge.s32.totalorder %s927_s15, 1  ;;  %p116_p8 = scmp.lt.s32.totalorder %s927_s15, 3 }
   0xc   : > { %p774_p9 = scmp.eq.s32.totalorder %s990_s16, 0  ;;  %s128_s26 = sshll.u32 %s1302_s1, 4  ;;  %s129_s26 = int_to_ptr.hbm [resolvable:$true] %s128_s26 }
   0xd   : > { %p117_p10 = pnand %p749_p7, %p116_p8  ;;  %s929_s27 = smov [#allocation4]  }
   0xe   : > { %s130_s28 = sshll.u32 %s929_s27, 4  ;;  %s131_s28 = int_to_ptr.vmem [resolvable:$true] %s130_s28 }
   0xf   : > { %p766_p11 = pneg %p117_p10  ;;  %153 = sbr.rel (%p117_p10) target bundleno = 787 (0x313), region = 32 }
  0x11   : > { %p767_p12 = pnand %p774_p9, %p766_p11 }
  0x13   : > { %769 = dma.hbm_to_vmem [thread:$0]  (!%p767_p12), %s129_s26, 128, %s131_s28, [#allocation5]  }
  0x14   : > { %906 = dma.done.wait (%p774_p9), [#allocation5], 128  }
  0x15   : > { %908 = vsyncadd (%p774_p9), [#allocation5], 4294967168  ;;  %p177_p13 = scmp.lt.s32.totalorder %s990_s16, 1  ;;  %vm181_vm0 = vcmask 117760   ;;  %vm183_vm1 = vcmask 1043576   ;;  %v930_v0 = vmov 0.0  }
  0x16   : > { %182 = vst.msk [vmem:[#allocation2] sm:$0xf] %vm181_vm0, %v930_v0  ;;  %s931_s7 = smov 15   ;;  %vm194_vm2 = vcmask 121860   ;;  %vm191_vm3 = vcmask 121856   ;;  %s932_s8 = smov 127  }
  0x17   : > { %s178_s29 = scalar_select %p177_p13, %s990_s16, 1  ;;  %184 = vst.msk [vmem:[#allocation2 + $0x4] sm:$0xf] %vm183_vm1, %v930_v0  ;;  %vm195_vm4 = vmor %vm194_vm2, %vm183_vm1  ;;  %vm207_vm5 = vcmask 1039360   ;;  %vm210_vm6 = vcmask 1043456   ;;  %vm377_vm7 = vcmask 949248  }
  0x18   : > { %185 = vst [vmem:[#allocation3 + $0x7c] sm:$0xf] %v930_v0  ;;  %s933_s9 = smov 116   ;;  %s934_s10 = smov 114   ;;  %vm405_vm8 = vcmask 932864   ;;  %vm612_vm9 = vcmask 801792  }
  0x19   : > { %s755_s30 = sshll.u32 %s178_s29, 2  ;;  %s935_s11 = smov 98   ;;  %vm433_vm10 = vcmask 916480   ;;  %vm461_vm11 = vcmask 900096   ;;  %vm489_vm12 = vcmask 883712   ;;  %vm517_vm13 = vcmask 867328  }
  0x1a   : > { %s180_s6 = scalar_lea.vmem %s1301_s0, %s755_s30  ;;  %s936_s17 = smov 112   ;;  %vm545_vm14 = vcmask 850944   ;;  %vm573_vm15 = vcmask 834560   ;;  %vm601_vm0 = vcmask 818176   ;;  %vm293_vm1 = vcmask 998400  }
  0x1b   : > { %v186_v1 = vld [vmem:[%s180_s6] sm:$0xf]  ;;  %s937_s19 = smov 110   ;;  %s938_s20 = smov 106   ;;  %vm349_vm2 = vcmask 965632  }
  0x1c   : > { %188 = vrot.lane.b32.xlu0 %v186_v1, %s931_s7  ;;  %s939_s24 = smov 108   ;;  %s940_s25 = smov 102  }
  0x1d   : > { %s941_s26 = smov 104   ;;  %s942_s27 = smov 120  }
  0x1e   : > { %s943_s28 = smov 100   ;;  %s944_s29 = smov 122  }
  0x1f   : > { %s945_s30 = smov 118   ;;  %s946_s4 = smov 126  }
  0x20   : > { %s947_s5 = smov 124  }
  0x8e   : > { %v189_v2 = vpop.permute.xlu0 %188 }
  0x8f   : > { %v190_v3 = vrot.slane %v189_v2, 4 }
  0x91   : > { %v192_v4 = vsel %vm191_vm3, %v190_v3, %v189_v2  ;;  %vm321_vm3 = vcmask 982016  }
  0x92   : > { %196 = vst.msk [vmem:[#allocation2] sm:$0xff] %vm195_vm4, %v192_v4  ;;  %vm265_vm4 = vcmask 1014784  }
  0x99   : > { %v1026_v5 = vld [vmem:[#allocation2] sm:$0xff] }
  0x9a   : > { %200 = vst [vmem:[#allocation1 + $0x1] ss:$2 sm:$0xff] %v1026_v5 }
  0xa1   : > { %v1029_v6 = vld.sshfl [vmem:[#allocation1] sm:$0xff pattern:$0x75316420]  ;;  %v1031_v7 = vld.sshfl [vmem:[#allocation1 + $0x8] sm:$0xff pattern:$0x75316420] }
  0xa2   : > { %213 = vst [vmem:[#allocation1] ss:$2 sm:$0xff] %v1026_v5 }
  0xa9   : > { %v1034_v8 = vld.sshfl [vmem:[#allocation1] sm:$0xff pattern:$0x75316420]  ;;  %v1036_v9 = vld.sshfl [vmem:[#allocation1 + $0x8] sm:$0xff pattern:$0x75316420] }
  0xaa   : > { %219 = vst [vmem:[#allocation1 + $0x1] ss:$2 sm:$0xff] %v1026_v5 }
  0xb1   : > { %v220_v10 = vld.sshfl [vmem:[#allocation1] sm:$0xff pattern:$0x75316420]  ;;  %v221_v11 = vld.sshfl [vmem:[#allocation1 + $0x8] sm:$0xff pattern:$0x75316420] }
  0xb2   : > { %241 = vst [vmem:[#allocation1] ss:$2 sm:$0xff] %v1026_v5  ;;  %224 = vrot.lane.b32.xlu1 %v221_v11, %s932_s8  ;;  %222 = vrot.lane.b32.xlu0 %v220_v10, %s932_s8 }
  0xb9   : > { %v1042_v12 = vld.sshfl [vmem:[#allocation1] sm:$0xff pattern:$0x75316420]  ;;  %v1044_v13 = vld.sshfl [vmem:[#allocation1 + $0x8] sm:$0xff pattern:$0x75316420] }
  0xba   : > { %247 = vst [vmem:[#allocation1 + $0x1] ss:$2 sm:$0xff] %v1026_v5 }
  0xc1   : > { %v248_v14 = vld.sshfl [vmem:[#allocation1] sm:$0xff pattern:$0x75316420]  ;;  %v249_v15 = vld.sshfl [vmem:[#allocation1 + $0x8] sm:$0xff pattern:$0x75316420] }
  0xc2   : > { %269 = vst [vmem:[#allocation1] ss:$2 sm:$0xff] %v1026_v5  ;;  %252 = vrot.lane.b32.xlu2 %v249_v15, %s932_s8  ;;  %250 = vrot.lane.b32.xlu1 %v248_v14, %s932_s8 }
  0xc9   : > { %v1050_v16 = vld.sshfl [vmem:[#allocation1] sm:$0xff pattern:$0x75316420]  ;;  %v1052_v17 = vld.sshfl [vmem:[#allocation1 + $0x8] sm:$0xff pattern:$0x75316420] }
  0xca   : > { %275 = vst [vmem:[#allocation1 + $0x1] ss:$2 sm:$0xff] %v1026_v5 }
  0xd1   : > { %v276_v18 = vld.sshfl [vmem:[#allocation1] sm:$0xff pattern:$0x75316420]  ;;  %v277_v19 = vld.sshfl [vmem:[#allocation1 + $0x8] sm:$0xff pattern:$0x75316420] }
  0xd2   : > { %297 = vst [vmem:[#allocation1] ss:$2 sm:$0xff] %v1026_v5  ;;  %280 = vrot.lane.b32.xlu0 %v277_v19, %s932_s8  ;;  %278 = vrot.lane.b32.xlu2 %v276_v18, %s932_s8 }
  0xd9   : > { %v1058_v20 = vld.sshfl [vmem:[#allocation1] sm:$0xff pattern:$0x75316420]  ;;  %v1060_v21 = vld.sshfl [vmem:[#allocation1 + $0x8] sm:$0xff pattern:$0x75316420] }
  0xda   : > { %303 = vst [vmem:[#allocation1 + $0x1] ss:$2 sm:$0xff] %v1026_v5 }
  0xe1   : > { %v304_v22 = vld.sshfl [vmem:[#allocation1] sm:$0xff pattern:$0x75316420]  ;;  %v305_v23 = vld.sshfl [vmem:[#allocation1 + $0x8] sm:$0xff pattern:$0x75316420] }
  0xe2   : > { %325 = vst [vmem:[#allocation1] ss:$2 sm:$0xff] %v1026_v5  ;;  %308 = vrot.lane.b32.xlu1 %v305_v23, %s932_s8  ;;  %306 = vrot.lane.b32.xlu0 %v304_v22, %s932_s8 }
  0xe9   : > { %v1066_v24 = vld.sshfl [vmem:[#allocation1] sm:$0xff pattern:$0x75316420]  ;;  %v1068_v25 = vld.sshfl [vmem:[#allocation1 + $0x8] sm:$0xff pattern:$0x75316420] }
  0xea   : > { %331 = vst [vmem:[#allocation1 + $0x1] ss:$2 sm:$0xff] %v1026_v5 }
  0xf1   : > { %v332_v26 = vld.sshfl [vmem:[#allocation1] sm:$0xff pattern:$0x75316420]  ;;  %v333_v27 = vld.sshfl [vmem:[#allocation1 + $0x8] sm:$0xff pattern:$0x75316420] }
  0xf2   : > { %353 = vst [vmem:[#allocation1] ss:$2 sm:$0xff] %v1026_v5  ;;  %336 = vrot.lane.b32.xlu2 %v333_v27, %s932_s8  ;;  %334 = vrot.lane.b32.xlu1 %v332_v26, %s932_s8 }
  0xf9   : > { %v1074_v28 = vld.sshfl [vmem:[#allocation1] sm:$0xff pattern:$0x75316420]  ;;  %v1076_v29 = vld.sshfl [vmem:[#allocation1 + $0x8] sm:$0xff pattern:$0x75316420] }
  0xfa   : > { %359 = vst [vmem:[#allocation1 + $0x1] ss:$2 sm:$0xff] %v1026_v5 }
 0x101   : > { %v360_v30 = vld.sshfl [vmem:[#allocation1] sm:$0xff pattern:$0x75316420]  ;;  %v361_v31 = vld.sshfl [vmem:[#allocation1 + $0x8] sm:$0xff pattern:$0x75316420] }
 0x102   : > { %381 = vst [vmem:[#allocation1] ss:$2 sm:$0xff] %v1026_v5  ;;  %364 = vrot.lane.b32.xlu0 %v361_v31, %s932_s8  ;;  %362 = vrot.lane.b32.xlu2 %v360_v30, %s932_s8 }
 0x109   : > { %v1082_v32 = vld.sshfl [vmem:[#allocation1] sm:$0xff pattern:$0x75316420]  ;;  %v1084_v33 = vld.sshfl [vmem:[#allocation1 + $0x8] sm:$0xff pattern:$0x75316420] }
 0x10a   : > { %387 = vst [vmem:[#allocation1 + $0x1] ss:$2 sm:$0xff] %v1026_v5 }
 0x111   : > { %v388_v34 = vld.sshfl [vmem:[#allocation1] sm:$0xff pattern:$0x75316420]  ;;  %v389_v35 = vld.sshfl [vmem:[#allocation1 + $0x8] sm:$0xff pattern:$0x75316420] }
 0x112   : > { %409 = vst [vmem:[#allocation1] ss:$2 sm:$0xff] %v1026_v5  ;;  %392 = vrot.lane.b32.xlu1 %v389_v35, %s932_s8  ;;  %390 = vrot.lane.b32.xlu0 %v388_v34, %s932_s8 }
 0x119   : > { %v1090_v36 = vld.sshfl [vmem:[#allocation1] sm:$0xff pattern:$0x75316420]  ;;  %v1092_v37 = vld.sshfl [vmem:[#allocation1 + $0x8] sm:$0xff pattern:$0x75316420] }
 0x11a   : > { %415 = vst [vmem:[#allocation1 + $0x1] ss:$2 sm:$0xff] %v1026_v5 }
 0x11c   : > { %v1112_v47 = vpop.permute.xlu2 %252 }
 0x121   : > { %v416_v38 = vld.sshfl [vmem:[#allocation1] sm:$0xff pattern:$0x75316420]  ;;  %v417_v39 = vld.sshfl [vmem:[#allocation1 + $0x8] sm:$0xff pattern:$0x75316420] }
 0x122   : > { %437 = vst [vmem:[#allocation1] ss:$2 sm:$0xff] %v1026_v5  ;;  %420 = vrot.lane.b32.xlu2 %v417_v39, %s932_s8  ;;  %418 = vrot.lane.b32.xlu1 %v416_v38, %s932_s8 }
 0x124   : > { %v1098_v40 = vpop.permute.xlu1 %224  ;;  %v223_v41 = vpop.permute.xlu0 %222 }
 0x125   : > { %v1102_v42 = vsel %vm207_vm5, %v223_v41, %v1098_v40 }
 0x129   : > { %v1104_v43 = vld.sshfl [vmem:[#allocation1] sm:$0xff pattern:$0x75316420]  ;;  %v1106_v44 = vld.sshfl [vmem:[#allocation1 + $0x8] sm:$0xff pattern:$0x75316420] }
 0x12a   : > { %443 = vst [vmem:[#allocation1 + $0x1] ss:$2 sm:$0xff] %v1026_v5 }
 0x12c   : > { %v279_v54 = vpop.permute.xlu2 %278 }
 0x131   : > { %v444_v45 = vld.sshfl [vmem:[#allocation1] sm:$0xff pattern:$0x75316420]  ;;  %v445_v46 = vld.sshfl [vmem:[#allocation1 + $0x8] sm:$0xff pattern:$0x75316420] }
 0x132   : > { %465 = vst [vmem:[#allocation1] ss:$2 sm:$0xff] %v1026_v5  ;;  %448 = vrot.lane.b32.xlu0 %v445_v46, %s932_s8  ;;  %446 = vrot.lane.b32.xlu2 %v444_v45, %s932_s8 }
 0x134   : > { %v251_v48 = vpop.permute.xlu1 %250 }
 0x135   : > { %v1116_v49 = vsel %vm207_vm5, %v251_v48, %v1112_v47 }
 0x139   : > { %v1118_v50 = vld.sshfl [vmem:[#allocation1] sm:$0xff pattern:$0x75316420]  ;;  %v1120_v51 = vld.sshfl [vmem:[#allocation1 + $0x8] sm:$0xff pattern:$0x75316420] }
 0x13a   : > { %471 = vst [vmem:[#allocation1 + $0x1] ss:$2 sm:$0xff] %v1026_v5 }
 0x141   : > { %v472_v52 = vld.sshfl [vmem:[#allocation1] sm:$0xff pattern:$0x75316420]  ;;  %v473_v53 = vld.sshfl [vmem:[#allocation1 + $0x8] sm:$0xff pattern:$0x75316420] }
 0x142   : > { %493 = vst [vmem:[#allocation1] ss:$2 sm:$0xff] %v1026_v5  ;;  %476 = vrot.lane.b32.xlu1 %v473_v53, %s932_s8  ;;  %474 = vrot.lane.b32.xlu0 %v472_v52, %s932_s8 }
 0x144   : > { %v1126_v55 = vpop.permute.xlu0 %280 }
 0x145   : > { %v1130_v56 = vsel %vm207_vm5, %v279_v54, %v1126_v55 }
 0x149   : > { %v1132_v57 = vld.sshfl [vmem:[#allocation1] sm:$0xff pattern:$0x75316420]  ;;  %v1134_v58 = vld.sshfl [vmem:[#allocation1 + $0x8] sm:$0xff pattern:$0x75316420] }
 0x14a   : > { %499 = vst [vmem:[#allocation1 + $0x1] ss:$2 sm:$0xff] %v1026_v5 }
 0x14c   : > { %v1154_v4 = vpop.permute.xlu2 %336 }
 0x151   : > { %v500_v59 = vld.sshfl [vmem:[#allocation1] sm:$0xff pattern:$0x75316420]  ;;  %v501_v60 = vld.sshfl [vmem:[#allocation1 + $0x8] sm:$0xff pattern:$0x75316420] }
 0x152   : > { %521 = vst [vmem:[#allocation1] ss:$2 sm:$0xff] %v1026_v5  ;;  %504 = vrot.lane.b32.xlu2 %v501_v60, %s932_s8  ;;  %502 = vrot.lane.b32.xlu1 %v500_v59, %s932_s8 }
 0x154   : > { %v1140_v61 = vpop.permute.xlu1 %308  ;;  %v307_v62 = vpop.permute.xlu0 %306 }
 0x155   : > { %v1144_v63 = vsel %vm207_vm5, %v307_v62, %v1140_v61 }
 0x159   : > { %v1146_v0 = vld.sshfl [vmem:[#allocation1] sm:$0xff pattern:$0x75316420]  ;;  %v1148_v1 = vld.sshfl [vmem:[#allocation1 + $0x8] sm:$0xff pattern:$0x75316420] }
 0x15a   : > { %527 = vst [vmem:[#allocation1 + $0x1] ss:$2 sm:$0xff] %v1026_v5 }
 0x15c   : > { %v363_v23 = vpop.permute.xlu2 %362 }
 0x161   : > { %v528_v2 = vld.sshfl [vmem:[#allocation1] sm:$0xff pattern:$0x75316420]  ;;  %v529_v3 = vld.sshfl [vmem:[#allocation1 + $0x8] sm:$0xff pattern:$0x75316420] }
 0x162   : > { %549 = vst [vmem:[#allocation1] ss:$2 sm:$0xff] %v1026_v5  ;;  %532 = vrot.lane.b32.xlu0 %v529_v3, %s932_s8  ;;  %530 = vrot.lane.b32.xlu2 %v528_v2, %s932_s8 }
 0x164   : > { %v335_v10 = vpop.permute.xlu1 %334 }
 0x165   : > { %v1158_v11 = vsel %vm207_vm5, %v335_v10, %v1154_v4 }
 0x169   : > { %v1160_v14 = vld.sshfl [vmem:[#allocation1] sm:$0xff pattern:$0x75316420]  ;;  %v1162_v15 = vld.sshfl [vmem:[#allocation1 + $0x8] sm:$0xff pattern:$0x75316420] }
 0x16a   : > { %555 = vst [vmem:[#allocation1 + $0x1] ss:$2 sm:$0xff] %v1026_v5 }
 0x171   : > { %v556_v18 = vld.sshfl [vmem:[#allocation1] sm:$0xff pattern:$0x75316420]  ;;  %v557_v19 = vld.sshfl [vmem:[#allocation1 + $0x8] sm:$0xff pattern:$0x75316420] }
 0x172   : > { %577 = vst [vmem:[#allocation1] ss:$2 sm:$0xff] %v1026_v5  ;;  %560 = vrot.lane.b32.xlu2 %v557_v19, %s932_s8  ;;  %558 = vrot.lane.b32.xlu1 %v556_v18, %s932_s8 }
 0x174   : > { %v365_v22 = vpop.permute.xlu0 %364 }
 0x175   : > { %v370_v26 = vsel %vm210_vm6, %v1076_v29, %v365_v22  ;;  %v366_v27 = vsel %vm207_vm5, %v363_v23, %v365_v22 }
 0x176   : > { %375 = vrot.lane.b32.xlu0 %v370_v26, %s933_s9  ;;  %v369_v34 = vsel %vm210_vm6, %v1074_v28, %v366_v27 }
 0x179   : > { %v1171_v30 = vld.sshfl [vmem:[#allocation1] sm:$0xff pattern:$0x75316420]  ;;  %v1173_v31 = vld.sshfl [vmem:[#allocation1 + $0x8] sm:$0xff pattern:$0x75316420] }
 0x17a   : > { %583 = vst [vmem:[#allocation1 + $0x1] ss:$2 sm:$0xff] %v1026_v5  ;;  %373 = vrot.lane.b32.xlu2 %v369_v34, %s933_s9 }
 0x17c   : > { %v421_v48 = vpop.permute.xlu2 %420 }
 0x17d   : > { %v426_v53 = vsel %vm210_vm6, %v1092_v37, %v421_v48 }
 0x181   : > { %v585_v35 = vld.sshfl [vmem:[#allocation1 + $0x8] sm:$0xff pattern:$0x75316420]  ;;  %v584_v38 = vld.sshfl [vmem:[#allocation1] sm:$0xff pattern:$0x75316420] }
 0x182   : > { %588 = vrot.lane.b32.xlu1 %v585_v35, %s932_s8  ;;  %586 = vrot.lane.b32.xlu0 %v584_v38, %s932_s8  ;;  %605 = vst [vmem:[#allocation1] ss:$2 sm:$0xff] %v1026_v5 }
 0x184   : > { %v393_v29 = vpop.permute.xlu1 %392  ;;  %v391_v39 = vpop.permute.xlu0 %390 }
 0x185   : > { %v394_v41 = vsel %vm207_vm5, %v391_v39, %v393_v29  ;;  %v398_v45 = vsel %vm210_vm6, %v1084_v33, %v393_v29 }
 0x186   : > { %v397_v28 = vsel %vm210_vm6, %v1082_v32, %v394_v41 }
 0x189   : > { %v606_v46 = vld.sshfl [vmem:[#allocation1] sm:$0xff pattern:$0x75316420]  ;;  %v607_v52 = vld.sshfl [vmem:[#allocation1 + $0x8] sm:$0xff pattern:$0x75316420] }
 0x18a   : > { %403 = vrot.lane.b32.xlu1 %v398_v45, %s934_s10  ;;  %401 = vrot.lane.b32.xlu0 %v397_v28, %s934_s10  ;;  %s757_s10 = sshll.u32 %s990_s16, 3 }
 0x18b   : > { %608 = vrot.lane.b32.xlu2 %v606_v46, %s935_s11 }
 0x18c   : > { %v447_v59 = vpop.permute.xlu2 %446 }
 0x192   : > { %610 = vrot.lane.b32.xlu0 %v607_v52, %s935_s11  ;;  %v286_v52 = vsel %vm210_vm6, %v1052_v17, %v1126_v55  ;;  %v229_v17 = vsel %vm210_vm6, %v1034_v8, %v1102_v42 }
 0x193   : > { %431 = vrot.lane.b32.xlu2 %v426_v53, %s936_s17 }
 0x194   : > { %v419_v54 = vpop.permute.xlu1 %418 }
 0x195   : > { %v422_v33 = vsel %vm207_vm5, %v419_v54, %v421_v48 }
 0x196   : > { %v425_v32 = vsel %vm210_vm6, %v1090_v36, %v422_v33 }
 0x197   : > { %429 = vrot.lane.b32.xlu1 %v425_v32, %s936_s17 }
 0x1a4   : > { %v449_v60 = vpop.permute.xlu0 %448 }
 0x1a5   : > { %v450_v62 = vsel %vm207_vm5, %v447_v59, %v449_v60  ;;  %v454_v2 = vsel %vm210_vm6, %v1106_v44, %v449_v60 }
 0x1a6   : > { %459 = vrot.lane.b32.xlu0 %v454_v2, %s937_s19  ;;  %v453_v37 = vsel %vm210_vm6, %v1104_v43, %v450_v62 }
 0x1a7   : > { %457 = vrot.lane.b32.xlu2 %v453_v37, %s937_s19  ;;  %s672_s19 = scalar_lea.hbm %s1304_s3, %s757_s10 }
 0x1ac   : > { %v505_v3 = vpop.permute.xlu2 %504 }
 0x1ad   : > { %v510_v10 = vsel %vm210_vm6, %v1134_v58, %v505_v3 }
 0x1af   : > { %515 = vrot.lane.b32.xlu2 %v510_v10, %s938_s20 }
 0x1b4   : > { %v477_v36 = vpop.permute.xlu1 %476  ;;  %v475_v18 = vpop.permute.xlu0 %474 }
 0x1b5   : > { %v478_v19 = vsel %vm207_vm5, %v475_v18, %v477_v36  ;;  %v482_v22 = vsel %vm210_vm6, %v1120_v51, %v477_v36 }
 0x1b6   : > { %487 = vrot.lane.b32.xlu1 %v482_v22, %s939_s24  ;;  %v481_v44 = vsel %vm210_vm6, %v1118_v50, %v478_v19 }
 0x1b7   : > { %485 = vrot.lane.b32.xlu0 %v481_v44, %s939_s24 }
 0x1bc   : > { %v531_v43 = vpop.permute.xlu2 %530 }
 0x1c4   : > { %v503_v23 = vpop.permute.xlu1 %502 }
 0x1c5   : > { %v506_v26 = vsel %vm207_vm5, %v503_v23, %v505_v3 }
 0x1c6   : > { %v509_v58 = vsel %vm210_vm6, %v1132_v57, %v506_v26  ;;  %v633_v26 = vld [vmem:[%s1303_s2] sm:$0xff] }
 0x1c7   : > { %513 = vrot.lane.b32.xlu1 %v509_v58, %s938_s20  ;;  %v948_v58 = vmov 0  }
 0x1c8   : > { %829 = vset.pattern.permute.xlu1 %v948_v58  ;;  %830 = vset.pattern.permute.xlu0 %v948_v58 }
 0x1cc   : > { %v561_v27 = vpop.permute.xlu2 %560 }
 0x1cd   : > { %v566_v34 = vsel %vm210_vm6, %v1162_v15, %v561_v27 }
 0x1cf   : > { %571 = vrot.lane.b32.xlu1 %v566_v34, %s940_s25 }
 0x1d4   : > { %v533_v51 = vpop.permute.xlu0 %532  ;;  %v374_v39 = vpop.permute.xlu2 %373 }
 0x1d5   : > { %v534_v35 = vsel %vm207_vm5, %v531_v43, %v533_v51  ;;  %v538_v50 = vsel %vm210_vm6, %v1148_v1, %v533_v51  ;;  %v313_v1 = vsel %vm210_vm6, %v1058_v20, %v1144_v63 }
 0x1d6   : > { %543 = vrot.lane.b32.xlu0 %v538_v50, %s941_s26  ;;  %v537_v38 = vsel %vm210_vm6, %v1146_v0, %v534_v35 }
 0x1d7   : > { %541 = vrot.lane.b32.xlu2 %v537_v38, %s941_s26 }
 0x1e4   : > { %v559_v57 = vpop.permute.xlu1 %558 }
 0x1e5   : > { %v562_v29 = vsel %vm207_vm5, %v559_v57, %v561_v27  ;;  %v609_v55 = vpop.permute.xlu2 %608 }
 0x1e6   : > { %v565_v15 = vsel %vm210_vm6, %v1160_v14, %v562_v29 }
 0x1e7   : > { %569 = vrot.lane.b32.xlu0 %v565_v15, %s940_s25  ;;  %s676_s25 = sshll.u32 %s672_s19, 4  ;;  %s677_s25 = int_to_ptr.hbm [resolvable:$true] %s676_s25 }
 0x1e8   : > { %v376_v41 = vpop.permute.xlu0 %375 }
 0x1e9   : > { %v1216_v45 = vsel %vm377_vm7, %v374_v39, %v376_v41  ;;  %vm237_vm7 = vcmask 1031168  }
 0x1ed   : > { %v432_v8 = vpop.permute.xlu2 %431 }
 0x1ef   : > { %317 = vrot.lane.b32.xlu0 %v313_v1, %s942_s27 }
 0x1f4   : > { %v589_v0 = vpop.permute.xlu1 %588  ;;  %v587_v28 = vpop.permute.xlu0 %586 }
 0x1f5   : > { %v590_v46 = vsel %vm207_vm5, %v587_v28, %v589_v0  ;;  %v594_v14 = vsel %vm210_vm6, %v1173_v31, %v589_v0  ;;  %v342_v31 = vsel %vm210_vm6, %v1068_v25, %v1154_v4  ;;  %v285_v25 = vsel %vm210_vm6, %v1050_v16, %v1130_v56  ;;  %v616_v28 = vld [vmem:[#allocation4] sm:$0xff] }
 0x1f6   : > { %599 = vrot.lane.b32.xlu2 %v594_v14, %s943_s28  ;;  %v593_v48 = vsel %vm210_vm6, %v1171_v30, %v590_v46  ;;  %v341_v30 = vsel %vm210_vm6, %v1066_v24, %v1158_v11  ;;  %v314_v24 = vsel %vm210_vm6, %v1060_v21, %v1140_v61  ;;  %v258_v11 = vsel %vm210_vm6, %v1044_v13, %v1112_v47 }
 0x1f7   : > { %597 = vrot.lane.b32.xlu1 %v593_v48, %s943_s28  ;;  %291 = vrot.lane.b32.xlu0 %v286_v52, %s944_s29  ;;  %v257_v21 = vsel %vm210_vm6, %v1042_v12, %v1116_v49 }
 0x1fc   : > { %v404_v20 = vpop.permute.xlu1 %403  ;;  %v402_v63 = vpop.permute.xlu0 %401 }
 0x1fd   : > { %v1230_v53 = vsel %vm405_vm8, %v402_v63, %v404_v20 }
 0x1fe   : > { %347 = vrot.lane.b32.xlu2 %v342_v31, %s945_s30 }
 0x1ff   : > { %345 = vrot.lane.b32.xlu1 %v341_v30, %s945_s30  ;;  %233 = vrot.lane.b32.xlu0 %v229_v17, %s946_s4  ;;  %s881_s30 = scalar_lea.hbm %s1304_s3, 16 }
 0x201   : > { %v458_v56 = vpop.permute.xlu2 %457 }
 0x204   : > { %v611_v54 = vpop.permute.xlu0 %610 }
 0x205   : > { %v613_v33 = vsel %vm612_vm9, %v609_v55, %v611_v54 }
 0x206   : > { %615 = vst [vmem:[#allocation3 + $0x78] sm:$0xf] %v613_v33  ;;  %289 = vrot.lane.b32.xlu2 %v285_v25, %s944_s29 }
 0x207   : > { %319 = vrot.lane.b32.xlu1 %v314_v24, %s942_s27  ;;  %205 = vrot.lane.b32.xlu0 %v1031_v7, %s932_s8  ;;  %v230_v7 = vsel %vm210_vm6, %v1036_v9, %v1098_v40  ;;  %s875_s27 = sshra.s32 %s677_s25, 4  ;;  %s876_s27 = int_to_ptr.hbm [resolvable:$true] %s875_s27 }
 0x208   : > { %s877_s28 = scalar_lea.hbm %s876_s27, 8  ;;  %p882_p3 = scmp.lt.s32.totalorder %s876_s27, %s1304_s3 }
 0x209   : > { %v430_v42 = vpop.permute.xlu1 %429  ;;  %v516_v60 = vpop.permute.xlu2 %515  ;;  %p878_p0 = scmp.ne.s32.totalorder %s876_s27, %s877_s28  ;;  %p883_p4 = scmp.lt.s32.totalorder %s881_s30, %s877_s28 }
 0x20a   : > { %v434_v4 = vsel %vm433_vm10, %v430_v42, %v432_v8 }
 0x20b   : > { %p879_p1 = pnand %p878_p0, %p1007_p5  ;;  %p884_p7 = por %p883_p4, %p882_p3 }
 0x20d   : > { %v632_v16 = vld [vmem:[#allocation3 + $0x78] sm:$0xff]  ;;  %p880_p2 = pneg %p879_p1 }
 0x20e   : > { %263 = vrot.lane.b32.xlu2 %v258_v11, %s947_s5  ;;  %639 = vmatpush.msra.mxu0 %v632_v16 }
 0x20f   : > { %261 = vrot.lane.b32.xlu1 %v257_v21, %s947_s5  ;;  %p885_p8 = pnand %p884_p7, %p880_p2 }
 0x216   : > { %203 = vrot.lane.b32.xlu2 %v1029_v6, %s932_s8  ;;  %s174_s8 = sand.u32 1, %s919_s13  }
 0x217   : > { %235 = vrot.lane.b32.xlu1 %v230_v7, %s946_s4  ;;  %s754_s9 = sshll.u32 %s174_s8, 3  ;;  %s662_s26 = scalar_lea.sflag [#allocation6], %s174_s8 }
 0x218   : > { %v460_v13 = vpop.permute.xlu0 %459  ;;  %s176_s20 = scalar_lea.vmem [#allocation7], %s754_s9 }
 0x219   : > { %v462_v47 = vsel %vm461_vm11, %v458_v56, %v460_v13  ;;  %s674_s24 = sshll.u32 %s176_s20, 4  ;;  %s675_s24 = int_to_ptr.vmem [resolvable:$true] %s674_s24 }
 0x21f   : > { %636 = vperm.xlu1 %829, %v633_v26  }
 0x228   : > { %v488_v61 = vpop.permute.xlu1 %487 }
 0x229   : > { %v486_v32 = vpop.permute.xlu0 %485 }
 0x22a   : > { %v490_v59 = vsel %vm489_vm12, %v486_v32, %v488_v61 }
 0x231   : > { %v542_v62 = vpop.permute.xlu2 %541 }
 0x239   : > { %v514_v12 = vpop.permute.xlu1 %513 }
 0x23a   : > { %v518_v49 = vsel %vm517_vm13, %v514_v12, %v516_v60 }
 0x241   : > { %v572_v9 = vpop.permute.xlu1 %571 }
 0x248   : > { %v544_v6 = vpop.permute.xlu0 %543 }
 0x249   : > { %v546_v2 = vsel %vm545_vm14, %v542_v62, %v544_v6 }
 0x250   : > { %v600_v37 = vpop.permute.xlu2 %599 }
 0x258   : > { %v348_v3 = vpop.permute.xlu2 %347 }
 0x259   : > { %v570_v40 = vpop.permute.xlu0 %569 }
 0x25a   : > { %v574_v10 = vsel %vm573_vm15, %v570_v40, %v572_v9 }
 0x260   : > { %v290_v18 = vpop.permute.xlu2 %289 }
 0x261   : > { %v318_v36 = vpop.permute.xlu0 %317 }
 0x268   : > { %v264_v23 = vpop.permute.xlu2 %263 }
 0x269   : > { %v598_v19 = vpop.permute.xlu1 %597  ;;  %v292_v22 = vpop.permute.xlu0 %291 }
 0x26a   : > { %v602_v44 = vsel %vm601_vm0, %v598_v19, %v600_v37  ;;  %v294_v43 = vsel %vm293_vm1, %v290_v18, %v292_v22 }
 0x26b   : > { %640 = vmatpush.msra.mxu0 %v602_v44 }
 0x26d   : > { %641 = vmatpush.msra.mxu0 %v574_v10 }
 0x26f   : > { %642 = vmatpush.msra.mxu0 %v546_v2 }
 0x270   : > { %v204_v35 = vpop.permute.xlu2 %203 }
 0x271   : > { %v346_v27 = vpop.permute.xlu1 %345  ;;  %v234_v34 = vpop.permute.xlu0 %233  ;;  %643 = vmatpush.msra.mxu0 %v518_v49 }
 0x272   : > { %v350_v51 = vsel %vm349_vm2, %v346_v27, %v348_v3 }
 0x273   : > { %644 = vmatpush.msra.mxu0 %v490_v59 }
 0x275   : > { %645 = vmatpush.msra.mxu0 %v462_v47 }
 0x277   : > { %646 = vmatpush.msra.mxu0 %v434_v4 }
 0x279   : > { %v320_v50 = vpop.permute.xlu1 %319  ;;  %v206_v38 = vpop.permute.xlu0 %205  ;;  %647 = vmatpush.msra.mxu0 %v1230_v53 }
 0x27a   : > { %v322_v57 = vsel %vm321_vm3, %v318_v36, %v320_v50  ;;  %v208_v29 = vsel %vm207_vm5, %v204_v35, %v206_v38 }
 0x27b   : > { %v211_v15 = vsel %vm210_vm6, %v1026_v5, %v208_v29  ;;  %648 = vmatpush.msra.mxu0 %v1216_v45 }
 0x27d   : > { %649 = vmatpush.msra.mxu0 %v350_v51 }
 0x27f   : > { %650 = vmatpush.msra.mxu0 %v322_v57 }
 0x281   : > { %v262_v39 = vpop.permute.xlu1 %261  ;;  %651 = vmatpush.msra.mxu0 %v294_v43 }
 0x282   : > { %v266_v41 = vsel %vm265_vm4, %v262_v39, %v264_v23 }
 0x283   : > { %652 = vmatpush.msra.mxu0 %v266_v41 }
 0x289   : > { %v236_v1 = vpop.permute.xlu1 %235 }
 0x28a   : > { %v238_v0 = vsel %vm237_vm7, %v234_v34, %v236_v1 }
 0x28b   : > { %653 = vmatpush.msra.mxu0 %v238_v0 }
 0x28d   : > { %654 = vmatpush.msra.mxu0 %v211_v15 }
 0x28e   : > { %655 = vmatmul.f32.vlgmr.msra.gmra.mxu0 %v616_v28 }
 0x291   : > { %v637_v5 = vpop.permute.xlu1 %636 }
 0x30b   : > { %v656_v45 = vpop.f32.mrf.mxu0 }
 0x30c   : > { %v657_v46 = vadd.f32 %v656_v45, %v637_v5 }
 0x30e   : > { %v659_v14 = vmax.f32 %v657_v46, 0.0 }
 0x310   : > { %660 = vst [vmem:[%s176_s20] sm:$0xff] %v659_v14 }
 0x311   : > { %888 = shalt.err (!%p885_p8)
}
 0x312   : > { %764 = dma.vmem_to_hbm [thread:$0]  (%p1007_p5), %s675_s24, 128, %s677_s25, %s662_s26  }
 0x313 PF: > { %p776_p9 = scmp.ge.s32.totalorder %s927_s15, 2  ;;  %s688_s6 = sand.u32 1, %s915_s12  }
 0x314   : > { %s689_s7 = scalar_lea.sflag [#allocation6], %s688_s6 }
 0x315   : > { %p771_p10 = pnand %p776_p9, %p1011_p6 }
 0x317   : > { %p772_p11 = pneg %p771_p10 }
 0x319   : > { %910 = dma.done.wait (%p772_p11), %s689_s7, 128  }
 0x31a   : > { %912 = vsyncadd (%p772_p11), %s689_s7, 4294967168  ;;  %p14_p12 = scmp.ge.s32.totalorder %s994_s18, 4   ;;  %s1307_s12 = smov %s919_s13 }
 0x31b   : > { %s1308_s13 = smov %s923_s14  ;;  %s1309_s14 = smov %s1005_s21 }
 0x31c   : > { %s1310_s15 = smov %s994_s18  ;;  %16 = sbr.rel (!%p14_p12) target bundleno = 4 (0x4), region = 87 }
 0x321   :  { %695 = vsyncpa [#allocation5], 1 }
 0x322   :  { %697 = vsyncpa [#allocation5 + $0x1], 1 }
 0x323   :  { %698 = vsyncpa [#allocation6], 1 }
 0x324   :  { %700 = vsyncpa [#allocation6 + $0x1], 1 }

</bundles_post_ra>
